<compile_context>
chip_gen: v6e
topology: v6e:2x2x1
jax: 0.10.0
libtpu: 0.0.40
codegen_flags: <defaults>
</compile_context>

<pallas_src>
import jax
import jax.numpy as jnp
from jax import lax
from jax.experimental import pallas as pl
from jax.experimental.pallas import tpu as pltpu


def _round_up(x, m):
    return ((x + m - 1) // m) * m


def _sublane_multiple(dtype):
    # (8,128) f32 / (16,128) bf16 / (32,128) int8-fp8 native tiling.
    return max(8, 32 // jnp.dtype(dtype).itemsize)


def _pick_tile(dim_pad, target, quantum):
    """Largest value <= target that divides dim_pad and is a multiple of
    `quantum` (dim_pad itself is a multiple of quantum, so this terminates)."""
    if dim_pad <= target:
        return dim_pad
    n = -(-dim_pad // target)  # ceil
    while dim_pad % n != 0 or (dim_pad // n) % quantum != 0:
        n += 1
    return dim_pad // n


def _vmem_budget_bytes():
    # Generation-aware cap with headroom for compiler-internal scratch.
    try:
        cap = pltpu.get_tpu_info().vmem_capacity_bytes
    except Exception:
        cap = 64 * 1024 * 1024  # conservative (v7x per-TensorCore)
    return int(cap * 0.7)


# ----------------------------------------------------------------------------
# Kernels
# ----------------------------------------------------------------------------
def _dense_kernel_fused(x_ref, w_ref, b_ref, o_ref):
    # Full K resident in VMEM: one MXU pass, bias add, cast, store.
    # x_ref: [tm, K]   w_ref: [K, tn]   b_ref: [1, tn]   o_ref: [tm, tn]
    acc = jnp.dot(x_ref[...], w_ref[...], preferred_element_type=jnp.float32)
    o_ref[...] = (acc + b_ref[...].astype(jnp.float32)).astype(o_ref.dtype)


def _dense_kernel_acc(x_ref, w_ref, b_ref, o_ref, acc_ref):
    # K tiled along the last ("arbitrary") grid axis; f32 VMEM accumulator.
    # x_ref: [tm, tk]  w_ref: [tk, tn]  b_ref: [1, tn]  o_ref/acc_ref: [tm, tn]
    k = pl.program_id(2)

    @pl.when(k == 0)
    def _():
        acc_ref[...] = jnp.zeros_like(acc_ref)

    acc_ref[...] += jnp.dot(x_ref[...], w_ref[...],
                            preferred_element_type=jnp.float32)

    @pl.when(k == pl.num_programs(2) - 1)
    def _():
        o_ref[...] = (acc_ref[...] + b_ref[...].astype(jnp.float32)
                      ).astype(o_ref.dtype)


# ----------------------------------------------------------------------------
# Init-time parameter preparation (done once, not per forward call)
# ----------------------------------------------------------------------------
def prepare_simple_connector_params(weight, bias, param_dtype=None):
    """weight: [out_dim, in_dim] (PyTorch convention), bias: [out_dim].

    Returns (w_kn, b_row, out_dim) where w_kn is the canonical [K_pad, N_pad]
    MXU RHS (lane-padded) and b_row is the [1, N_pad] bias row.
    Optionally casts the weight (e.g. to bfloat16) for reduced HBM traffic.
    """
    out_dim, in_dim = weight.shape
    if param_dtype is not None:
        weight = weight.astype(param_dtype)
    K_pad = _round_up(in_dim, 128)
    N_pad = _round_up(out_dim, 128)
    w_kn = weight.T  # [K, N]
    if (K_pad, N_pad) != (in_dim, out_dim):
        w_kn = jnp.pad(w_kn, ((0, K_pad - in_dim), (0, N_pad - out_dim)))
    b_row = bias.reshape(1, out_dim)
    if N_pad != out_dim:
        b_row = jnp.pad(b_row, ((0, 0), (0, N_pad - out_dim)))
    return w_kn, b_row, out_dim


# ----------------------------------------------------------------------------
# Forward
# ----------------------------------------------------------------------------
def simple_connector_forward(features, w_kn, b_row, out_dim,
                             *, tm=512, tn=512, tk=512, fuse_k=None):
    """features: [..., in_dim]; w_kn/b_row from prepare_simple_connector_params.
    Returns [..., out_dim]."""
    in_dim = features.shape[-1]
    K_pad, N_pad = w_kn.shape
    lead = features.shape[:-1]

    x2d = features.reshape(-1, in_dim)  # [M, K]
    M = x2d.shape[0]
    sub = max(_sublane_multiple(features.dtype), _sublane_multiple(w_kn.dtype))

    x_bytes = jnp.dtype(x2d.dtype).itemsize
    w_bytes = jnp.dtype(w_kn.dtype).itemsize
    b_bytes = jnp.dtype(b_row.dtype).itemsize
    o_bytes = jnp.dtype(features.dtype).itemsize

    budget = _vmem_budget_bytes()

    # ---- tile selection ----
    tm = min(_round_up(tm, sub), _round_up(M, sub))
    tn = _pick_tile(N_pad, tn, 128)

    def footprint(tm_, tn_, tk_, fused_):
        f = (2 * tm_ * tk_ * x_bytes      # X double buffer
             + 2 * tk_ * tn_ * w_bytes    # W double buffer
             + 2 * tn_ * b_bytes          # bias double buffer
             + 2 * tm_ * tn_ * o_bytes)   # output double buffer
        if not fused_:
            f += tm_ * tn_ * 4            # f32 accumulator scratch
        return f

    fused = fuse_k if fuse_k is not None else (
        footprint(tm, tn, K_pad, True) <= budget)
    tk = K_pad if fused else _pick_tile(K_pad, tk, 128)

    # Shrink tiles until the (double-buffered) working set fits the budget.
    while footprint(tm, tn, tk, fused) > budget:
        if (not fused) and tk > 128:
            tk = _pick_tile(K_pad, tk // 2, 128)
        elif tn > 128:
            tn = _pick_tile(N_pad, tn // 2, 128)
        elif tm > sub:
            tm = max(sub, _round_up(tm // 2, sub))
        else:
            break

    # Give the v7x megacore at least two parallel tiles (no-op on v5e/v6e).
    M_pad = _round_up(M, tm)
    if (M_pad // tm) * (N_pad // tn) == 1:
        half = tm // 2
        if half >= sub and half % sub == 0 and M_pad % half == 0:
            tm = half
    M_pad = _round_up(M, tm)

    # ---- per-call padding: activations only (params were padded at init) ----
    if (M_pad, K_pad) != (M, in_dim):
        x2d = jnp.pad(x2d, ((0, M_pad - M), (0, K_pad - in_dim)))

    fp = footprint(tm, tn, tk, fused)
    vmem_limit = int(min(max(2 * fp, 16 * 1024 * 1024), budget))
    vmem_limit = max(vmem_limit, fp + (1 << 20))

    cost = pl.CostEstimate(
        flops=2 * M_pad * N_pad * K_pad,
        transcendentals=0,
        bytes_accessed=(M_pad * K_pad * x_bytes
                        + (M_pad // tm) * K_pad * N_pad * w_bytes
                        + N_pad * b_bytes
                        + M_pad * N_pad * o_bytes),
    )

    out_shape = jax.ShapeDtypeStruct((M_pad, N_pad), features.dtype)

    if fused:
        grid = (M_pad // tm, N_pad // tn)
        out = pl.pallas_call(
            _dense_kernel_fused,
            out_shape=out_shape,
            grid_spec=pltpu.PrefetchScalarGridSpec(
                num_scalar_prefetch=0,
                grid=grid,
                in_specs=[
                    pl.BlockSpec((tm, K_pad), lambda i, j: (i, 0)),   # X
                    pl.BlockSpec((K_pad, tn), lambda i, j: (0, j)),   # W [K,N]
                    pl.BlockSpec((1, tn), lambda i, j: (0, j)),       # bias
                ],
                out_specs=pl.BlockSpec((tm, tn), lambda i, j: (i, j)),
            ),
            compiler_params=pltpu.CompilerParams(
                dimension_semantics=("parallel", "parallel"),
                vmem_limit_bytes=vmem_limit,
            ),
            cost_estimate=cost,
        )(x2d, w_kn, b_row)
    else:
        grid = (M_pad // tm, N_pad // tn, K_pad // tk)
        out = pl.pallas_call(
            _dense_kernel_acc,
            out_shape=out_shape,
            grid_spec=pltpu.PrefetchScalarGridSpec(
                num_scalar_prefetch=0,
                grid=grid,
                in_specs=[
                    pl.BlockSpec((tm, tk), lambda i, j, k: (i, k)),   # X
                    pl.BlockSpec((tk, tn), lambda i, j, k: (k, j)),   # W [K,N]
                    pl.BlockSpec((1, tn), lambda i, j, k: (0, j)),    # bias
                ],
                out_specs=pl.BlockSpec((tm, tn), lambda i, j, k: (i, j)),
                scratch_shapes=[pltpu.VMEM((tm, tn), jnp.float32)],
            ),
            compiler_params=pltpu.CompilerParams(
                dimension_semantics=("parallel", "parallel", "arbitrary"),
                vmem_limit_bytes=vmem_limit,
            ),
            cost_estimate=cost,
        )(x2d, w_kn, b_row)

    return out[:M, :out_dim].reshape(*lead, out_dim)


if __name__ == "__main__":
    key = jax.random.PRNGKey(0)

    def linear_init(k, in_dim, out_dim):
        # Deterministic init mimicking nn.Linear's uniform(-1/sqrt(in), 1/sqrt(in))
        k_w, k_b = jax.random.split(k)
        bound = 1.0 / (in_dim ** 0.5)
        w = jax.random.uniform(k_w, (out_dim, in_dim), minval=-bound,
                               maxval=bound, dtype=jnp.float32)
        b = jax.random.uniform(k_b, (out_dim,), minval=-bound,
                               maxval=bound, dtype=jnp.float32)
        return w, b

    # --- test 1: small connector, fused-K single-pass path -------------------
    batch, seq, input_dim, output_dim = 2, 8, 32, 32
    k_x, k_p, key = jax.random.split(key, 3)
    features = jax.random.normal(k_x, (batch, seq, input_dim), dtype=jnp.float32)
    weight, bias = linear_init(k_p, input_dim, output_dim)

    w_kn, b_row, odim = prepare_simple_connector_params(weight, bias)
    out = simple_connector_forward(features, w_kn, b_row, odim)
    out = jax.block_until_ready(out)

    ref = jnp.einsum("bsd,od->bso", features, weight,
                     precision=lax.Precision.HIGHEST) + bias
    assert out.shape == (batch, seq, output_dim)
    assert jnp.allclose(out, ref, atol=1e-4, rtol=1e-4)

    # --- test 2: larger in_dim, forced K-tiled accumulator path --------------
    batch, seq, input_dim, output_dim = 2, 8, 256, 64
    k_x, k_p, key = jax.random.split(key, 3)
    features = jax.random.normal(k_x, (batch, seq, input_dim), dtype=jnp.float32)
    weight, bias = linear_init(k_p, input_dim, output_dim)

    w_kn, b_row, odim = prepare_simple_connector_params(weight, bias)
    out = simple_connector_forward(features, w_kn, b_row, odim,
                                   tk=128, fuse_k=False)
    out = jax.block_until_ready(out)

    ref = jnp.einsum("bsd,od->bso", features, weight,
                     precision=lax.Precision.HIGHEST) + bias
    assert out.shape == (batch, seq, output_dim)
    assert jnp.allclose(out, ref, atol=1e-4, rtol=1e-4)

    print("KERNEL_OK")
</pallas_src>

<mosaic_0001>
module attributes {stable_mosaic.version = 11 : i64} {
  func.func @_dense_kernel_fused(%arg0: i32, %arg1: i32, %arg2: memref<8x128xf32, #tpu.memory_space<vmem>>, %arg3: memref<128x128xf32, #tpu.memory_space<vmem>>, %arg4: memref<1x128xf32, #tpu.memory_space<vmem>>, %arg5: memref<8x128xf32, #tpu.memory_space<vmem>>) attributes {dimension_semantics = [#tpu.dimension_semantics<parallel>, #tpu.dimension_semantics<parallel>], iteration_bounds = array<i64: 2, 1>, scalar_prefetch = 0 : i64, scratch_operands = 0 : i64, tpu.core_type = #tpu.core_type<tc>, window_params = [{transform_indices = @transform_0, window_bounds = array<i64: 8, 128>}, {transform_indices = @transform_1, window_bounds = array<i64: 128, 128>}, {transform_indices = @transform_2, window_bounds = array<i64: 1, 128>}, {transform_indices = @transform_3, window_bounds = array<i64: 8, 128>}]} {
    %c0 = arith.constant 0 : index
    %c0_0 = arith.constant 0 : index
    %0 = vector.load %arg2[%c0, %c0_0] : memref<8x128xf32, #tpu.memory_space<vmem>>, vector<8x128xf32>
    %c0_1 = arith.constant 0 : index
    %c0_2 = arith.constant 0 : index
    %1 = vector.load %arg3[%c0_1, %c0_2] : memref<128x128xf32, #tpu.memory_space<vmem>>, vector<128x128xf32>
    %cst = arith.constant dense<0.000000e+00> : vector<8x128xf32>
    %2 = tpu.matmul %0, %1, %cst {dimension_numbers = #tpu.dot_dimension_numbers<[1], [0], [0], [1], [0, 0, 1, 1], [], []>} : vector<8x128xf32>, vector<128x128xf32>, vector<8x128xf32> -> vector<8x128xf32>
    %c0_3 = arith.constant 0 : index
    %c0_4 = arith.constant 0 : index
    %3 = vector.load %arg4[%c0_3, %c0_4] : memref<1x128xf32, #tpu.memory_space<vmem>>, vector<1x128xf32>
    %4 = vector.broadcast %3 : vector<1x128xf32> to vector<8x128xf32>
    %5 = arith.addf %2, %4 : vector<8x128xf32>
    %c0_5 = arith.constant 0 : index
    %c0_6 = arith.constant 0 : index
    %6 = vector.load %arg5[%c0_5, %c0_6] : memref<8x128xf32, #tpu.memory_space<vmem>>, vector<8x128xf32>
    tpu.vector_store %arg5[%c0_5, %c0_6], %5 {strides = array<i32>} : memref<8x128xf32, #tpu.memory_space<vmem>>, vector<8x128xf32>,
    return
  }
  func.func @transform_0(%arg0: i32, %arg1: i32) -> (i32, i32) {
    %c0_i32 = arith.constant 0 : i32
    %c0_i32_0 = arith.constant 0 : i32
    return %arg0, %c0_i32 : i32, i32
  }
  func.func @transform_1(%arg0: i32, %arg1: i32) -> (i32, i32) {
    %c0_i32 = arith.constant 0 : i32
    %c0_i32_0 = arith.constant 0 : i32
    return %c0_i32, %arg1 : i32, i32
  }
  func.func @transform_2(%arg0: i32, %arg1: i32) -> (i32, i32) {
    %c0_i32 = arith.constant 0 : i32
    %c0_i32_0 = arith.constant 0 : i32
    return %c0_i32, %arg1 : i32, i32
  }
  func.func @transform_3(%arg0: i32, %arg1: i32) -> (i32, i32) {
    %c0_i32 = arith.constant 0 : i32
    return %arg0, %arg1 : i32, i32
  }
}

</mosaic_0001>

<bundles_post_ra>
// kernel: tpu_custom_call.1
= control target key start
LH: loop header
LB: loop body
LE: loop exit
PB: predicated region body
PF: predicated region fallthrough
CT: control target
= control target key end

     0   :  { %8 = vsyncpa [#allocation3], 0  ;;  %s945_s0 = inlined_call_operand.hbm [shape: f32[16,128], index: 0, kind: input, shape index: {}]   ;;  %s946_s1 = inlined_call_operand.hbm [shape: f32[128,128], index: 1, kind: input, shape index: {}]   ;;  %s947_s2 = inlined_call_operand.vmem [shape: f32[1,128], index: 2, kind: input, shape index: {}]   ;;  %s948_s3 = inlined_call_operand.hbm [shape: f32[16,128], index: 3, kind: output, shape index: {}]  }
   0x1   :  { %10 = vsyncpa [#allocation3 + $0x1], 0 }
   0x2   :  { %11 = vsyncpa [#allocation6], 0 }
   0x3   :  { %12 = vsyncpa [#allocation4], 0 }
   0x4   :  { %14 = vsyncpa [#allocation4 + $0x1], 0  ;;  %s762_s12 = smov 0   ;;  %s764_s13 = smov 0  }
   0x5   :  { %s766_s14 = smov 0   ;;  %s768_s15 = smov 0  }
   0x6   :  { %s770_s16 = smov 0   ;;  %s772_s17 = smov 0  }
   0x7 LB: > { %s449_s18 = sadd.s32 4294967295, %s733_s17   ;;  %s450_s19 = sadd.s32 4294967294, %s733_s17   ;;  %s733_s17 = sphi %s772_s17, %s20_s17   ;;  %s729_s16 = sphi %s770_s16, %s966_s16   ;;  %s725_s15 = sphi %s768_s15, %s965_s15   ;;  %s721_s14 = sphi %s766_s14, %s964_s14   ;;  %s717_s13 = sphi %s764_s13, %s963_s13   ;;  %s713_s12 = sphi %s762_s12, %s962_s12  }
   0x8   : > { %p52_p0 = scmp.ne.s32.totalorder %s717_s13, %s713_s12  ;;  %p796_p1 = scmp.eq.s32.totalorder %s449_s18, 0 }
   0x9   : > { %p800_p2 = scmp.eq.s32.totalorder %s449_s18, 1  ;;  %p136_p3 = scmp.eq.s32.totalorder %s450_s19, 1 }
   0xa   : > { %p806_p4 = por %p796_p1, %p52_p0  ;;  %p451_p5 = scmp.ge.s32.totalorder %s733_s17, 1 }
   0xb   : > { %p811_p6 = por %p136_p3, %p52_p0  ;;  %p143_p7 = scmp.lt.s32.totalorder %s733_s17, 3 }
   0xc   : > { %s952_s22 = scalar_select %p806_p4, 1, 0 }
   0xd   : > { %s953_s23 = scalar_select %p811_p6, 1, 0 }
   0xe   : > { %p816_p8 = pnand %p451_p5, %p143_p7  ;;  %s735_s25 = smov [#allocation5]  }
   0xf   : > { %s157_s26 = sshll.u32 %s735_s25, 4  ;;  %s32_s28 = sadd.s32 1, %s729_s16  ;;  %s158_s26 = int_to_ptr.vmem [resolvable:$true] %s157_s26 }
  0x10   : > { %p526_p9 = pneg %p816_p8  ;;  %s606_s29 = scalar_lea.vmem %s158_s26, 2048 }
  0x11   : > { %p607_p13 = scmp.ne.s32.totalorder %s158_s26, %s606_s29  ;;  %p614_p5 = scmp.lt.s32.totalorder %s158_s26, %s158_s26 }
  0x12   : > { %p825_p11 = pnand %p526_p9, %p796_p1  ;;  %p615_p7 = scmp.lt.s32.totalorder %s606_s29, %s606_s29 }
  0x14   : > { %p597_p12 = pneg %p825_p11  ;;  %p616_p6 = por %p615_p7, %p614_p5 }
  0x16   : > { %p609_p0 = pnand %p607_p13, %p597_p12 }
  0x18   : > { %p610_p3 = pneg %p609_p0 }
  0x1a   : > { %p617_p4 = pnand %p616_p6, %p610_p3 }
  0x1c   : > { %620 = shalt.err (!%p617_p4)
}
  0x1d   : > { %s736_s30 = smov 128   ;;  %s737_s4 = smov 8  }
  0x1e   : > { %529 = dma.hbm_to_vmem [thread:$0]  (!%p825_p11), %s946_s1, 2048, %s158_s26, [#allocation6], %s736_s30, %s736_s30, %s737_s4  }
  0x1f   : > { %p34_p6 = scmp.ge.s32.totalorder %s32_s28, 2  ;;  %s39_s7 = sadd.s32 1, %s721_s14 }
  0x20   : > { %p46_p4 = scmp.ne.s32.totalorder %s721_s14, %s717_s13  ;;  %p47_p9 = scmp.eq.s32.totalorder %s733_s17, 0 }
  0x21   : > { %s968_s28 = smov (%p34_p6, %s32_s28), 0  ;;  %p539_p0 = scmp.lt.s32.totalorder %s733_s17, 2 }
  0x22   : > { %p843_p12 = por %p47_p9, %p46_p4  ;;  %p849_p13 = por %p800_p2, %p46_p4 }
  0x23   : > { %s36_s10 = ssub.s32 %s729_s16, %s968_s28  ;;  %s177_s11 = sand.u32 1, %s721_s14  }
  0x24   : > { %p37_p11 = scmp.eq.s32.totalorder %s36_s10, 0  ;;  %s455_s18 = sshll.u32 %s177_s11, 3 }
  0x25   : > { %s456_s25 = sshll.u32 %s729_s16, 7  ;;  %s181_s30 = scalar_lea.vmem [#allocation2], %s455_s18 }
  0x26   : > { %s858_s19 = scalar_select %p37_p11, %s721_s14, %s39_s7  }
  0x27   : > { %s186_s29 = scalar_lea.hbm %s945_s0, %s456_s25  ;;  %s188_s4 = sshll.u32 %s181_s30, 4  ;;  %s189_s4 = int_to_ptr.vmem [resolvable:$true] %s188_s4 }
  0x28   : > { %p866_p2 = pnand %p539_p0, %p843_p12  ;;  %s178_s5 = scalar_lea.sflag [#allocation3], %s177_s11 }
  0x29   : > { %s634_s6 = scalar_lea.vmem %s189_s4, 128  ;;  %s738_s7 = smov [#allocation2]  }
  0x2a   : > { %p623_p3 = pneg %p866_p2  ;;  %p635_p5 = scmp.ne.s32.totalorder %s189_s4, %s634_s6 }
  0x2b   : > { %s639_s10 = sshll.u32 %s738_s7, 4  ;;  %s640_s10 = int_to_ptr.vmem [resolvable:$false] %s639_s10 }
  0x2c   : > { %p637_p7 = pnand %p635_p5, %p623_p3  ;;  %s641_s25 = scalar_lea.vmem %s640_s10, 256 }
  0x2d   : > { %p642_p4 = scmp.lt.s32.totalorder %s189_s4, %s640_s10  ;;  %p643_p9 = scmp.lt.s32.totalorder %s641_s25, %s634_s6 }
  0x2e   : > { %p638_p6 = pneg %p637_p7 }
  0x2f   : > { %p644_p11 = por %p643_p9, %p642_p4 }
  0x31   : > { %p645_p10 = pnand %p644_p11, %p638_p6 }
  0x33   : > { %648 = shalt.err (!%p645_p10)
}
  0x34   : > { %533 = dma.hbm_to_vmem [thread:$0]  (!%p866_p2), %s186_s29, 128, %s189_s4, %s178_s5  }
  0x35   : > { %197 = sbr.rel (%p816_p8) target bundleno = 302 (0x12e), region = 32  ;;  %s877_s8 = sand.u32 (!%p816_p8), 1, %s717_s13  }
  0x36   : > { %s458_s11 = sshll.u32 (!%p816_p8), %s877_s8, 3  ;;  %s200_s18 = scalar_lea.sflag (!%p816_p8), [#allocation3], %s877_s8 }
  0x37   : > { %s883_s26 = scalar_lea.vmem (!%p816_p8), [#allocation2], %s458_s11  ;;  %p959_p12 = scmp.ne.s32.totalorder (!%p816_p8), %s952_s22, 0 }
  0x3a   : > { %700 = dma.done.wait (%p959_p12), %s200_s18, 128  }
  0x3b   : > { %702 = vsyncadd (%p959_p12), %s200_s18, 4294967168 }
  0x3c   : > { %704 = dma.done.wait (%p796_p1), [#allocation6], 2048  }
  0x3d   : > { %706 = vsyncadd (%p796_p1), [#allocation6], 4294965248  ;;  %v739_v0 = vmov 0.0   ;;  %vm740_vm0 = vmmov 0   ;;  %v252_v1 = vld [vmem:[#allocation5 + $0x78] sm:$0xff]  ;;  %v251_v2 = vld [vmem:[#allocation5 + $0x70] sm:$0xff] }
  0x3e   : > { %483 = vmatprep.subr.mxu0 %v739_v0  ;;  %515 = vmatprep.mubr.msk.f32.mxu0 %vm740_vm0, %v739_v0  ;;  %v250_v3 = vld [vmem:[#allocation5 + $0x68] sm:$0xff]  ;;  %v249_v4 = vld [vmem:[#allocation5 + $0x60] sm:$0xff]  ;;  %v248_v5 = vld [vmem:[#allocation5 + $0x58] sm:$0xff]  ;;  %s463_s24 = sshll.u32 %s725_s15, 7  ;;  %s232_s27 = scalar_lea.vmem [#allocation7], %s458_s11 }
  0x3f   : > { %484 = vmatpush3.msra.mxu0 %v252_v1  ;;  %v247_v6 = vld [vmem:[#allocation5 + $0x50] sm:$0xff]  ;;  %v246_v7 = vld [vmem:[#allocation5 + $0x48] sm:$0xff]  ;;  %v245_v8 = vld [vmem:[#allocation5 + $0x40] sm:$0xff]  ;;  %s346_s29 = sshll.u32 %s232_s27, 4  ;;  %s903_s21 = scalar_lea.hbm %s948_s3, %s463_s24  ;;  %s347_s29 = int_to_ptr.vmem [resolvable:$true] %s346_s29 }
  0x40   : > { %485 = vmatprep.subr.mxu0 %v739_v0  ;;  %v244_v9 = vld [vmem:[#allocation5 + $0x38] sm:$0xff]  ;;  %v243_v10 = vld [vmem:[#allocation5 + $0x30] sm:$0xff]  ;;  %v242_v11 = vld [vmem:[#allocation5 + $0x28] sm:$0xff]  ;;  %s332_s5 = scalar_lea.sflag [#allocation4], %s877_s8  ;;  %s649_s6 = scalar_lea.vmem %s347_s29, 128 }
  0x41   : > { %486 = vmatpush3.msra.mxu0 %v251_v2  ;;  %v241_v12 = vld [vmem:[#allocation5 + $0x20] sm:$0xff]  ;;  %v240_v13 = vld [vmem:[#allocation5 + $0x18] sm:$0xff]  ;;  %v239_v14 = vld [vmem:[#allocation5 + $0x10] sm:$0xff]  ;;  %p650_p1 = scmp.ne.s32.totalorder %s347_s29, %s649_s6  ;;  %s741_s15 = smov [#allocation7]  }
  0x42   : > { %487 = vmatprep.subr.mxu0 %v739_v0  ;;  %v238_v15 = vld [vmem:[#allocation5 + $0x8] sm:$0xff]  ;;  %v237_v16 = vld [vmem:[#allocation5] sm:$0xff]  ;;  %v236_v17 = vld [vmem:[%s883_s26] sm:$0xff]  ;;  %s653_s7 = sshll.u32 %s741_s15, 4  ;;  %s654_s7 = int_to_ptr.vmem [resolvable:$false] %s653_s7 }
  0x43   : > { %488 = vmatpush3.msra.mxu0 %v250_v3  ;;  %v461_v18 = vld [vmem:[%s947_s2] ss:$0 sm:$0xff]  ;;  %p651_p8 = pnand %p650_p1, %p849_p13  ;;  %s655_s10 = scalar_lea.vmem %s654_s7, 256 }
  0x44   : > { %489 = vmatprep.subr.mxu0 %v739_v0  ;;  %p656_p0 = scmp.lt.s32.totalorder %s347_s29, %s654_s7  ;;  %p657_p2 = scmp.lt.s32.totalorder %s655_s10, %s649_s6 }
  0x45   : > { %490 = vmatpush3.msra.mxu0 %v249_v4  ;;  %p652_p10 = pneg %p651_p8 }
  0x46   : > { %491 = vmatprep.subr.mxu0 %v739_v0  ;;  %p658_p3 = por %p657_p2, %p656_p0 }
  0x47   : > { %492 = vmatpush3.msra.mxu0 %v248_v5 }
  0x48   : > { %493 = vmatprep.subr.mxu0 %v739_v0  ;;  %p659_p5 = pnand %p658_p3, %p652_p10 }
  0x49   : > { %494 = vmatpush3.msra.mxu0 %v247_v6 }
  0x4a   : > { %495 = vmatprep.subr.mxu0 %v739_v0 }
  0x4b   : > { %496 = vmatpush3.msra.mxu0 %v246_v7 }
  0x4c   : > { %497 = vmatprep.subr.mxu0 %v739_v0 }
  0x4d   : > { %498 = vmatpush3.msra.mxu0 %v245_v8 }
  0x4e   : > { %499 = vmatprep.subr.mxu0 %v739_v0 }
  0x4f   : > { %500 = vmatpush3.msra.mxu0 %v244_v9 }
  0x50   : > { %501 = vmatprep.subr.mxu0 %v739_v0 }
  0x51   : > { %502 = vmatpush3.msra.mxu0 %v243_v10 }
  0x52   : > { %503 = vmatprep.subr.mxu0 %v739_v0 }
  0x53   : > { %504 = vmatpush3.msra.mxu0 %v242_v11 }
  0x54   : > { %505 = vmatprep.subr.mxu0 %v739_v0 }
  0x55   : > { %506 = vmatpush3.msra.mxu0 %v241_v12 }
  0x56   : > { %507 = vmatprep.subr.mxu0 %v739_v0 }
  0x57   : > { %508 = vmatpush3.msra.mxu0 %v240_v13 }
  0x58   : > { %509 = vmatprep.subr.mxu0 %v739_v0 }
  0x59   : > { %510 = vmatpush3.msra.mxu0 %v239_v14 }
  0x5a   : > { %511 = vmatprep.subr.mxu0 %v739_v0 }
  0x5b   : > { %512 = vmatpush3.msra.mxu0 %v238_v15 }
  0x5c   : > { %513 = vmatprep.subr.mxu0 %v739_v0 }
  0x5d   : > { %514 = vmatpush3.msra.mxu0 %v237_v16 }
  0x5e   : > { %516 = vmatmul.mubr.f32.vlgmr.msra.gmra.mxu0 %v236_v17 }
 0x11e   : > { %v326_v19 = vpop.f32.mrf.mxu0 }
 0x11f   : > { %v327_v20 = vadd.f32 %v461_v18, %v326_v19 }
 0x120   : > { %v517_v21 = vpop.f32.mrf.mxu0 }
 0x121   : > { %330 = vst [vmem:[%s232_s27] sm:$0xff] %v327_v20 }
 0x122   : > { %662 = shalt.err (!%p659_p5)
}
 0x123   : > { %s663_s25 = scalar_lea.hbm %s903_s21, 128  ;;  %s667_s18 = scalar_lea.hbm %s948_s3, 256 }
 0x124   : > { %p664_p7 = scmp.ne.s32.totalorder %s903_s21, %s663_s25  ;;  %p668_p9 = scmp.lt.s32.totalorder %s903_s21, %s948_s3 }
 0x125   : > { %p669_p11 = scmp.lt.s32.totalorder %s667_s18, %s663_s25 }
 0x126   : > { %p665_p6 = pnand %p664_p7, %p849_p13 }
 0x127   : > { %p670_p12 = por %p669_p11, %p668_p9 }
 0x128   : > { %p666_p4 = pneg %p665_p6 }
 0x12a   : > { %p671_p1 = pnand %p670_p12, %p666_p4 }
 0x12c   : > { %674 = shalt.err (!%p671_p1)
}
 0x12d   : > { %524 = dma.vmem_to_hbm [thread:$0]  (%p849_p13), %s347_s29, 128, %s903_s21, %s332_s5  }
 0x12e PF: > { %s358_s22 = sand.u32 1, %s713_s12   ;;  %p960_p8 = scmp.ne.s32.totalorder %s953_s23, 0 }
 0x12f   : > { %p961_p10 = scmp.ge.s32.totalorder %s733_s17, 2  ;;  %s359_s24 = scalar_lea.sflag [#allocation4], %s358_s22 }
 0x131   : > { %p535_p0 = pnand %p961_p10, %p960_p8 }
 0x133   : > { %p536_p2 = pneg %p535_p0 }
 0x135   : > { %708 = dma.done.wait (%p536_p2), %s359_s24, 128  }
 0x136   : > { %710 = vsyncadd (%p536_p2), %s359_s24, 4294967168  ;;  %s20_s17 = sadd.s32 1, %s733_s17   ;;  %s962_s12 = smov %s717_s13 }
 0x137   : > { %p17_p3 = scmp.ge.s32.totalorder %s20_s17, 4   ;;  %s963_s13 = smov %s721_s14 }
 0x138   : > { %s964_s14 = smov %s858_s19  ;;  %s965_s15 = smov %s729_s16 }
 0x139   : > { %s966_s16 = smov %s968_s28  ;;  %19 = sbr.rel (!%p17_p3) target bundleno = 7 (0x7), region = 85 }
 0x13e   :  { %364 = vsyncpa [#allocation3], 1 }
 0x13f   :  { %366 = vsyncpa [#allocation3 + $0x1], 1 }
 0x140   :  { %367 = vsyncpa [#allocation6], 1 }
 0x141   :  { %368 = vsyncpa [#allocation4], 1 }
 0x142   :  { %370 = vsyncpa [#allocation4 + $0x1], 1 }

</bundles_post_ra>
